<compile_context>
chip_gen: v6e
topology: v6e:2x2x1
jax: 0.10.0
libtpu: 0.0.40
codegen_flags: <defaults>
</compile_context>

<pallas_src>
import jax
import jax.numpy as jnp
from jax.experimental import pallas as pl
from jax.experimental.pallas import tpu as pltpu


# ----------------------------------------------------------------------------
# Fused consumer kernel: y = x * constant.  The scalar rides in as a (1,1)
# f32 SMEM input; the multiply is free VPU filler inside the resident tile.
# ----------------------------------------------------------------------------
def _scale_kernel(scale_ref, x_ref, o_ref):
    # Cast the f32 SMEM scalar into the compute dtype explicitly, and cast the
    # result to the output dtype explicitly (keeps bf16/int8 paths clean).
    s = scale_ref[0, 0].astype(x_ref.dtype)
    o_ref[...] = (x_ref[...] * s).astype(o_ref.dtype)


def _min_sublane(dtype) -> int:
    # f32 -> 8, bf16 -> 16, int8/fp8 -> 32 (sublane packing for sub-32-bit dtypes).
    itemsize = jnp.dtype(dtype).itemsize
    return max(8, 8 * (4 // max(1, itemsize)))


def scale_by_scalar(x: jax.Array, constant_2d: jax.Array,
                    *, tm: int | None = None, donate_x: bool = False) -> jax.Array:
    """y = x * constant, tiled with lane-dense full-width row blocks."""
    M, N = x.shape
    itemsize = jnp.dtype(x.dtype).itemsize
    sublane = _min_sublane(x.dtype)

    if tm is None:
        # Target ~2 MiB per tile -> 2 arrays * 2 buffers * 2 MiB = 8 MiB VMEM,
        # inside the default scoped limit on v5e/v6e/v7x (no vmem_limit bump).
        target_tile_bytes = 2 * 1024 * 1024
        rows = max(sublane,
                   (target_tile_bytes // max(1, N * itemsize)) // sublane * sublane)
        # Keep at least 2 grid steps (feed both v7x TensorCores) when M allows.
        half = ((pl.cdiv(M, 2) + sublane - 1) // sublane) * sublane
        rows = min(rows, max(sublane, half))
        # Never larger than M padded to the sublane multiple.
        tm = min(rows, ((M + sublane - 1) // sublane) * sublane)

    grid = (pl.cdiv(M, tm),)  # partial last block is masked by Pallas; no dropped rows

    extra = {}
    if donate_x:
        # x is dead after scaling: reuse its HBM allocation for the output.
        extra["input_output_aliases"] = {1: 0}

    return pl.pallas_call(
        _scale_kernel,
        out_shape=jax.ShapeDtypeStruct((M, N), x.dtype),
        grid=grid,
        in_specs=[
            pl.BlockSpec((1, 1), lambda i: (0, 0), memory_space=pltpu.SMEM),
            pl.BlockSpec((tm, N), lambda i: (i, 0)),   # full-width, lane-dense
        ],
        out_specs=pl.BlockSpec((tm, N), lambda i: (i, 0)),
        compiler_params=pltpu.CompilerParams(
            dimension_semantics=("parallel",)),
        **extra,
    )(constant_2d, x)


# ----------------------------------------------------------------------------
# JAX analogue of the PyTorch `Scalar` nn.Module.
# ----------------------------------------------------------------------------
class ScalarModule:
    def __init__(self, init_value: float):
        # Parameter materialized once as a (1, 1) f32 array: the shape Pallas
        # consumer kernels want for SMEM delivery.  Semantically identical to
        # torch.tensor(init_value, dtype=torch.float32).
        self.constant_2d = jnp.full((1, 1), init_value, dtype=jnp.float32)

    @property
    def constant(self) -> jax.Array:
        return self.constant_2d[0, 0]

    def __call__(self) -> jax.Array:
        # Per perf review: forward() is a parameter read — no Pallas launch.
        # (An aliased SMEM identity kernel can never beat not launching one.)
        return self.constant


if __name__ == "__main__":
    key = jax.random.PRNGKey(0)
    init_value = float(jax.random.uniform(key, (), minval=-1.0, maxval=1.0))

    module = ScalarModule(init_value)

    # Forward pass: returns exactly the parameter value (0-d f32), kernel-free.
    out = jax.block_until_ready(module())
    assert out.shape == ()
    assert out.dtype == jnp.float32
    assert jnp.allclose(out, jnp.float32(init_value)), (out, init_value)

    # Fused-consumer Pallas kernel: f32 path (32x256 -> 2 parallel grid steps).
    x = jax.random.normal(jax.random.PRNGKey(1), (32, 256), dtype=jnp.float32)
    y = jax.block_until_ready(scale_by_scalar(x, module.constant_2d))
    assert y.shape == x.shape and y.dtype == x.dtype
    assert jnp.allclose(y, x * jnp.float32(init_value), rtol=1e-6, atol=1e-6)

    # bf16 path with a non-divisible row count (exercises dtype-aware sublane
    # tiling, pl.cdiv grid with a partial last block, and explicit casting).
    xb = jax.random.normal(jax.random.PRNGKey(2), (48, 128), dtype=jnp.bfloat16)
    yb = jax.block_until_ready(scale_by_scalar(xb, module.constant_2d))
    assert yb.shape == xb.shape and yb.dtype == jnp.bfloat16
    ref = (xb.astype(jnp.float32) * jnp.float32(init_value)).astype(jnp.bfloat16)
    assert jnp.allclose(yb.astype(jnp.float32), ref.astype(jnp.float32),
                        rtol=1e-2, atol=1e-2)

    # Donated-input variant: output reuses x's HBM allocation.
    yd = jax.block_until_ready(scale_by_scalar(x, module.constant_2d, donate_x=True))
    assert jnp.allclose(yd, x * jnp.float32(init_value), rtol=1e-6, atol=1e-6)

    print("KERNEL_OK")
</pallas_src>

<mosaic_0001>
module attributes {stable_mosaic.version = 11 : i64} {
  func.func @_scale_kernel(%arg0: i32, %arg1: memref<1x1xf32, #tpu.memory_space<smem>>, %arg2: memref<16x256xf32, #tpu.memory_space<vmem>>, %arg3: memref<16x256xf32, #tpu.memory_space<vmem>>) attributes {dimension_semantics = [#tpu.dimension_semantics<parallel>], iteration_bounds = array<i64: 2>, scalar_prefetch = 0 : i64, scratch_operands = 0 : i64, tpu.core_type = #tpu.core_type<tc>, window_params = [{transform_indices = @transform_0, window_bounds = array<i64: 1, 1>}, {transform_indices = @transform_1, window_bounds = array<i64: 16, 256>}, {transform_indices = @transform_2, window_bounds = array<i64: 16, 256>}]} {
    %c0 = arith.constant 0 : index
    %c0_0 = arith.constant 0 : index
    %0 = memref.load %arg1[%c0, %c0_0] : memref<1x1xf32, #tpu.memory_space<smem>>
    %c0_1 = arith.constant 0 : index
    %c0_2 = arith.constant 0 : index
    %1 = vector.load %arg2[%c0_1, %c0_2] : memref<16x256xf32, #tpu.memory_space<vmem>>, vector<16x256xf32>
    %2 = vector.broadcast %0 : f32 to vector<16x256xf32>
    %3 = arith.mulf %1, %2 : vector<16x256xf32>
    %c0_3 = arith.constant 0 : index
    %c0_4 = arith.constant 0 : index
    %4 = vector.load %arg3[%c0_3, %c0_4] : memref<16x256xf32, #tpu.memory_space<vmem>>, vector<16x256xf32>
    tpu.vector_store %arg3[%c0_3, %c0_4], %3 {strides = array<i32>} : memref<16x256xf32, #tpu.memory_space<vmem>>, vector<16x256xf32>,
    return
  }
  func.func @transform_0(%arg0: i32) -> (i32, i32) {
    %c0_i32 = arith.constant 0 : i32
    %c0_i32_0 = arith.constant 0 : i32
    %c0_i32_1 = arith.constant 0 : i32
    return %c0_i32, %c0_i32_0 : i32, i32
  }
  func.func @transform_1(%arg0: i32) -> (i32, i32) {
    %c0_i32 = arith.constant 0 : i32
    %c0_i32_0 = arith.constant 0 : i32
    return %arg0, %c0_i32 : i32, i32
  }
  func.func @transform_2(%arg0: i32) -> (i32, i32) {
    %c0_i32 = arith.constant 0 : i32
    %c0_i32_0 = arith.constant 0 : i32
    return %arg0, %c0_i32 : i32, i32
  }
}

</mosaic_0001>

<bundles_post_ra>
// kernel: tpu_custom_call.1
= control target key start
LH: loop header
LB: loop body
LE: loop exit
PB: predicated region body
PF: predicated region fallthrough
CT: control target
= control target key end

     0   :  { %s610_s0 = inlined_call_operand.<no memory space> [shape: f32[1,1], index: 0, kind: input, shape index: {}]   ;;  %s611_s1 = inlined_call_operand.hbm [shape: f32[32,256], index: 1, kind: input, shape index: {}]   ;;  %s612_s2 = inlined_call_operand.hbm [shape: f32[32,256], index: 2, kind: output, shape index: {}]  }
   0x1   :  { %7 = sst [smem:[#allocation2]] %s610_s0 }
   0x2   :  { %8 = vsyncpa [#allocation4], 0 }
   0x3   :  { %10 = vsyncpa [#allocation4 + $0x1], 0 }
   0x4   :  { %11 = vsyncpa [#allocation5], 0 }
   0x5   :  { %13 = vsyncpa [#allocation5 + $0x1], 0  ;;  %s456_s11 = smov 0   ;;  %s458_s12 = smov 0  }
   0x6   :  { %s460_s13 = smov 0   ;;  %s462_s14 = smov 0  }
   0x7 LB: > { %s477_s0 = sadd.s32 4294967295, %s430_s14   ;;  %s268_s15 = sadd.s32 4294967294, %s430_s14   ;;  %s430_s14 = sphi %s462_s14, %s627_s14   ;;  %s426_s13 = sphi %s460_s13, %s626_s13   ;;  %s422_s12 = sphi %s458_s12, %s625_s12   ;;  %s418_s11 = sphi %s456_s11, %s624_s11  }
   0x8   : > { %s481_s16 = sadd.s32 1, %s430_s14   ;;  %s47_s17 = sadd.s32 1, %s426_s13 }
   0x9   : > { %s44_s18 = ssub.s32 %s430_s14, %s481_s16  ;;  %p54_p0 = scmp.ne.s32.totalorder %s426_s13, %s422_s12 }
   0xa   : > { %p45_p1 = scmp.eq.s32.totalorder %s44_s18, 0  ;;  %p55_p2 = scmp.eq.s32.totalorder %s430_s14, 0 }
   0xb   : > { %p60_p3 = scmp.ne.s32.totalorder %s422_s12, %s418_s11  ;;  %p61_p4 = scmp.eq.s32.totalorder %s477_s0, 0 }
   0xc   : > { %s493_s19 = scalar_select %p45_p1, %s426_s13, %s47_s17  }
   0xd   : > { %p495_p5 = por %p55_p2, %p54_p0  ;;  %p499_p6 = por %p61_p4, %p60_p3 }
   0xe   : > { %p84_p7 = scmp.eq.s32.totalorder %s477_s0, 1  ;;  %p90_p8 = scmp.eq.s32.totalorder %s268_s15, 1 }
   0xf   : > { %s616_s21 = scalar_select %p499_p6, 1, 0 }
  0x10   : > { %p300_p10 = scmp.lt.s32.totalorder %s430_s14, 2  ;;  %p506_p11 = por %p84_p7, %p54_p0 }
  0x11   : > { %p510_p12 = por %p90_p8, %p60_p3  ;;  %s113_s24 = sand.u32 1, %s426_s13  }
  0x12   : > { %s617_s22 = scalar_select %p506_p11, 1, 0 }
  0x13   : > { %s618_s23 = scalar_select %p510_p12, 1, 0 }
  0x14   : > { %s285_s25 = sshll.u32 %s430_s14, 9  ;;  %s271_s26 = sshll.u32 %s113_s24, 5 }
  0x15   : > { %s519_s29 = scalar_lea.hbm %s611_s1, %s285_s25  ;;  %s117_s30 = scalar_lea.vmem [#allocation3], %s271_s26 }
  0x16   : > { %s125_s3 = sshll.u32 %s117_s30, 4  ;;  %p523_p13 = pnand %p300_p10, %p495_p5  ;;  %s527_s3 = int_to_ptr.vmem [resolvable:$true] %s125_s3 }
  0x17   : > { %s529_s5 = scalar_lea.sflag [#allocation4], %s113_s24  ;;  %s338_s6 = scalar_lea.hbm %s519_s29, 512 }
  0x18   : > { %p339_p0 = scmp.ne.s32.totalorder %s519_s29, %s338_s6  ;;  %p340_p1 = pneg %p523_p13 }
  0x19   : > { %s343_s9 = scalar_lea.hbm %s611_s1, 1024  ;;  %p344_p4 = scmp.lt.s32.totalorder %s519_s29, %s611_s1 }
  0x1a   : > { %p341_p2 = pnand %p340_p1, %p339_p0  ;;  %p345_p5 = scmp.lt.s32.totalorder %s343_s9, %s338_s6 }
  0x1c   : > { %p342_p3 = pneg %p341_p2  ;;  %p346_p7 = por %p345_p5, %p344_p4 }
  0x1e   : > { %p347_p8 = pnand %p346_p7, %p342_p3 }
  0x20   : > { %350 = shalt.err (!%p347_p8)
}
  0x21   : > { %s351_s17 = scalar_lea.vmem %s527_s3, 512  ;;  %s432_s18 = smov [#allocation3]  }
  0x22   : > { %p352_p10 = scmp.ne.s32.totalorder %s527_s3, %s351_s17  ;;  %s356_s20 = sshll.u32 %s432_s18, 4  ;;  %s357_s20 = int_to_ptr.vmem [resolvable:$false] %s356_s20 }
  0x23   : > { %s358_s24 = scalar_lea.vmem %s357_s20, 1024  ;;  %p359_p2 = scmp.lt.s32.totalorder %s527_s3, %s357_s20 }
  0x24   : > { %p354_p9 = pnand %p352_p10, %p340_p1  ;;  %p360_p12 = scmp.lt.s32.totalorder %s358_s24, %s351_s17 }
  0x26   : > { %p355_p0 = pneg %p354_p9  ;;  %p361_p11 = por %p360_p12, %p359_p2 }
  0x28   : > { %p362_p6 = pnand %p361_p11, %p355_p0 }
  0x2a   : > { %365 = shalt.err (!%p362_p6)
}
  0x2b   : > { %s433_s25 = smov 256   ;;  %s434_s26 = smov 16  }
  0x2c   : > { %295 = dma.hbm_to_vmem [thread:$0]  (!%p523_p13), %s519_s29, 512, %s527_s3, %s529_s5, %s433_s25, %s433_s25, %s434_s26  }
  0x2d   : > { %p275_p9 = scmp.ge.s32.totalorder %s430_s14, 1  ;;  %p133_p1 = scmp.lt.s32.totalorder %s430_s14, 3 }
  0x2f   : > { %p134_p3 = pnand %p275_p9, %p133_p1 }
  0x30   : > { %s553_s27 = sand.u32 (!%p134_p3), 1, %s422_s12   ;;  %p620_p6 = scmp.ne.s32.totalorder (!%p134_p3), %s616_s21, 0 }
  0x31   : > { %137 = sbr.rel (%p134_p3) target bundleno = 81 (0x51), region = 28  ;;  %s276_s28 = sshll.u32 (!%p134_p3), %s553_s27, 5 }
  0x32   : > { %s140_s30 = scalar_lea.sflag (!%p134_p3), [#allocation4], %s553_s27  ;;  %s143_s6 = scalar_lea.vmem (!%p134_p3), [#allocation3], %s276_s28 }
  0x36   : > { %409 = dma.done.wait (%p620_p6), %s140_s30, 512  }
  0x37   : > { %411 = vsyncadd (%p620_p6), %s140_s30, 4294966784  ;;  %s166_s29 = sld [smem:[#allocation2]]  ;;  %s163_s3 = scalar_lea.vmem [#allocation6], %s276_s28  ;;  %v167_v0 = vld [vmem:[%s143_s6] sm:$0xff]  ;;  %v168_v2 = vld [vmem:[%s143_s6 + $0x8] sm:$0xff] }
  0x38   : > { %s195_s4 = sshll.u32 %s163_s3, 4  ;;  %s287_s5 = sshll.u32 %s477_s0, 9  ;;  %v169_v3 = vld [vmem:[%s143_s6 + $0x10] sm:$0xff]  ;;  %v170_v7 = vld [vmem:[%s143_s6 + $0x18] sm:$0xff]  ;;  %s562_s4 = int_to_ptr.vmem [resolvable:$true] %s195_s4 }
  0x39   : > { %s567_s8 = scalar_lea.hbm %s612_s2, %s287_s5  ;;  %s181_s0 = scalar_lea.sflag [#allocation5], %s553_s27 }
  0x3a   : > { %s366_s9 = scalar_lea.vmem %s562_s4, 512  ;;  %p621_p12 = scmp.ne.s32.totalorder %s617_s22, 0 }
  0x3b   : > { %p367_p11 = scmp.ne.s32.totalorder %s562_s4, %s366_s9  ;;  %s435_s10 = smov [#allocation6]  }
  0x3c   : > { %s370_s15 = sshll.u32 %s435_s10, 4  ;;  %s371_s15 = int_to_ptr.vmem [resolvable:$false] %s370_s15 }
  0x3d   : > { %v171_v1 = vstv %s166_s29  ;;  %p368_p13 = pnand %p367_p11, %p621_p12  ;;  %s372_s17 = scalar_lea.vmem %s371_s15, 1024 }
  0x3e   : > { %v172_v4 = vmul.f32 %v171_v1, %v167_v0  ;;  %v173_v5 = vmul.f32 %v171_v1, %v168_v2  ;;  %v174_v6 = vmul.f32 %v171_v1, %v169_v3  ;;  %v175_v8 = vmul.f32 %v171_v1, %v170_v7  ;;  %p373_p5 = scmp.lt.s32.totalorder %s562_s4, %s371_s15  ;;  %p374_p7 = scmp.lt.s32.totalorder %s372_s17, %s366_s9 }
  0x3f   : > { %p369_p4 = pneg %p368_p13 }
  0x40   : > { %176 = vst [vmem:[%s163_s3] sm:$0xff] %v172_v4  ;;  %177 = vst [vmem:[%s163_s3 + $0x8] sm:$0xff] %v173_v5  ;;  %p375_p8 = por %p374_p7, %p373_p5 }
  0x41   : > { %178 = vst [vmem:[%s163_s3 + $0x10] sm:$0xff] %v174_v6  ;;  %179 = vst [vmem:[%s163_s3 + $0x18] sm:$0xff] %v175_v8 }
  0x42   : > { %p376_p10 = pnand %p375_p8, %p369_p4 }
  0x44   : > { %379 = shalt.err (!%p376_p10)
}
  0x45   : > { %s380_s18 = scalar_lea.hbm %s567_s8, 512  ;;  %s384_s25 = scalar_lea.hbm %s612_s2, 1024 }
  0x46   : > { %p381_p0 = scmp.ne.s32.totalorder %s567_s8, %s380_s18  ;;  %p385_p1 = scmp.lt.s32.totalorder %s567_s8, %s612_s2 }
  0x47   : > { %p386_p3 = scmp.lt.s32.totalorder %s384_s25, %s380_s18 }
  0x48   : > { %p382_p2 = pnand %p381_p0, %p621_p12 }
  0x49   : > { %p387_p6 = por %p386_p3, %p385_p1 }
  0x4a   : > { %p383_p9 = pneg %p382_p2 }
  0x4c   : > { %p388_p11 = pnand %p387_p6, %p383_p9 }
  0x4e   : > { %391 = shalt.err (!%p388_p11)
}
  0x4f   : > { %s436_s30 = smov 256   ;;  %s437_s6 = smov 16  }
  0x50   : > { %290 = dma.vmem_to_hbm [thread:$0]  (%p621_p12), %s562_s4, 512, %s567_s8, %s181_s0, %s436_s30, %s436_s30, %s437_s6  }
  0x51 PF: > { %s210_s29 = sand.u32 1, %s418_s11   ;;  %p622_p13 = scmp.ne.s32.totalorder %s618_s23, 0 }
  0x52   : > { %p623_p4 = scmp.ge.s32.totalorder %s430_s14, 2  ;;  %s211_s3 = scalar_lea.sflag [#allocation5], %s210_s29 }
  0x54   : > { %p297_p5 = pnand %p623_p4, %p622_p13 }
  0x56   : > { %p298_p7 = pneg %p297_p5 }
  0x58   : > { %413 = dma.done.wait (%p298_p7), %s211_s3, 512  }
  0x59   : > { %415 = vsyncadd (%p298_p7), %s211_s3, 4294966784  ;;  %p16_p8 = scmp.ge.s32.totalorder %s481_s16, 4   ;;  %s624_s11 = smov %s422_s12 }
  0x5a   : > { %s625_s12 = smov %s426_s13  ;;  %s626_s13 = smov %s493_s19 }
  0x5b   : > { %s627_s14 = smov %s481_s16  ;;  %18 = sbr.rel (!%p16_p8) target bundleno = 7 (0x7), region = 73 }
  0x60   :  { %216 = vsyncpa [#allocation4], 1 }
  0x61   :  { %218 = vsyncpa [#allocation4 + $0x1], 1 }
  0x62   :  { %219 = vsyncpa [#allocation5], 1 }
  0x63   :  { %221 = vsyncpa [#allocation5 + $0x1], 1 }

</bundles_post_ra>
